<compile_context>
chip_gen: v7x
topology: tpu7x:2x2x1
jax: 0.10.0
libtpu: 0.0.40
codegen_flags: <defaults>
</compile_context>

<pallas_src>
import math

import jax
import jax.numpy as jnp
from jax.experimental import pallas as pl
from jax.experimental.pallas import tpu as pltpu


def _make_tfidf_kernel(logit_threshold: float):
    """K-tiled matmul accumulating in the f32 scores output block."""

    def kernel(x_ref, w_ref, b_ref, scores_ref, preds_ref):
        k = pl.program_id(2)

        @pl.when(k == 0)
        def _():
            scores_ref[...] = jnp.zeros_like(scores_ref)

        # MXU: bf16 x bf16 -> f32, accumulated directly in the resident
        # output block (scores index_map ignores k).
        scores_ref[...] += jnp.dot(
            x_ref[...], w_ref[...], preferred_element_type=jnp.float32
        )

        @pl.when(k == pl.num_programs(2) - 1)
        def _():
            s = scores_ref[...] + b_ref[...]
            scores_ref[...] = s
            # sigmoid(s) > t  <=>  s > log(t / (1 - t))   (exact, no EUP op).
            preds_ref[...] = (s > logit_threshold).astype(jnp.int8)

    return kernel


def _round_up(x, m):
    return ((x + m - 1) // m) * m


def _pad2d(a, rows, cols):
    pr, pc = rows - a.shape[0], cols - a.shape[1]
    if pr == 0 and pc == 0:
        return a
    return jnp.pad(a, ((0, pr), (0, pc)))


def prepare_tfidf_params(weight_t, bias, *, compute_dtype=jnp.bfloat16,
                         tm_max=128, tn_max=512, tk_max=2048):
    """Pad + cast the linear layer ONCE (hoisted out of the forward path).

    weight_t: [V, C] f32 (nn.Linear weight, pre-transposed), bias: [C] f32.
    """
    V, C = weight_t.shape
    assert bias.shape == (C,)
    assert tm_max % 32 == 0, "tm_max must be a multiple of 32 (int8 preds tile)"
    assert tn_max % 128 == 0, "tn_max must be a multiple of 128 (lane-dense)"
    assert tk_max % 128 == 0, "tk_max must be a multiple of 128"

    tn = min(_round_up(C, 128), tn_max)
    Cp = _round_up(C, tn)
    tk = min(_round_up(V, 128), tk_max)
    Vp = _round_up(V, tk)

    w = _pad2d(jnp.asarray(weight_t, jnp.float32).astype(compute_dtype), Vp, Cp)
    b2 = _pad2d(jnp.asarray(bias, jnp.float32).reshape(1, C), 1, Cp)

    return dict(
        weight=w, bias=b2, V=V, C=C, Vp=Vp, Cp=Cp,
        tn=tn, tk=tk, tm_max=tm_max, compute_dtype=compute_dtype,
    )


def tfidf_forward(tfidfs, params, threshold=0.5):
    """tfidfs: [B, V] f32 dense TF-IDF matrix; params from prepare_tfidf_params.

    Returns (preds [B, C] bool, scores [B, C] f32), matching the torch module.
    """
    B, V = tfidfs.shape
    assert V == params["V"]
    assert 0.0 < threshold < 1.0
    logit_t = float(math.log(threshold / (1.0 - threshold)))

    C, Vp, Cp = params["C"], params["Vp"], params["Cp"]
    tn, tk, tm_max = params["tn"], params["tk"], params["tm_max"]

    # tm multiple of 32 (int8 preds pack (32,128); also covers bf16's 16).
    tm = min(_round_up(B, 32), tm_max)
    Bp = _round_up(B, tm)

    # Only the (small) activations are padded/cast per call.
    x = _pad2d(tfidfs.astype(params["compute_dtype"]), Bp, Vp)
    w = params["weight"]
    b2 = params["bias"]

    # (batch tiles, class tiles, reduction tiles) — reduction axis last.
    grid = (Bp // tm, Cp // tn, Vp // tk)

    # Explicit VMEM budget from the double-buffered block sizes (v5e default
    # scoped limit is 16 MiB; v7x physical is 64 MiB).
    bs = jnp.dtype(params["compute_dtype"]).itemsize
    vmem_bytes = (
        2 * tm * tk * bs        # activations
        + 2 * tk * tn * bs      # weight
        + 2 * tn * 4            # bias
        + 2 * tm * tn * 4       # scores (f32)
        + 2 * tm * tn * 1       # preds (int8)
    )
    vmem_limit = min(max(2 * vmem_bytes, 32 << 20), 64 << 20)

    scores_p, preds_p = pl.pallas_call(
        _make_tfidf_kernel(logit_t),
        out_shape=(
            jax.ShapeDtypeStruct((Bp, Cp), jnp.float32),
            jax.ShapeDtypeStruct((Bp, Cp), jnp.int8),
        ),
        grid_spec=pltpu.PrefetchScalarGridSpec(
            num_scalar_prefetch=0,
            grid=grid,
            in_specs=[
                pl.BlockSpec((tm, tk), lambda i, j, k: (i, k)),   # activations
                pl.BlockSpec((tk, tn), lambda i, j, k: (k, j)),   # weight
                pl.BlockSpec((1, tn), lambda i, j, k: (0, j)),    # bias
            ],
            out_specs=[
                pl.BlockSpec((tm, tn), lambda i, j, k: (i, j)),   # scores (f32)
                pl.BlockSpec((tm, tn), lambda i, j, k: (i, j)),   # preds (int8)
            ],
        ),
        compiler_params=pltpu.CompilerParams(
            dimension_semantics=("parallel", "parallel", "arbitrary"),
            vmem_limit_bytes=vmem_limit,
        ),
    )(x, w, b2)

    scores = scores_p[:B, :C]
    preds = preds_p[:B, :C] != 0
    return preds, scores


if __name__ == "__main__":
    # Small, deterministic shapes consistent with the module:
    #   vocab_size = len(vectorizer.vocabulary_) -> 256
    #   num classes -> 128, batch of captions -> 8
    B, V, C = 8, 256, 128
    threshold = 0.5

    key = jax.random.PRNGKey(0)
    k_tfidf, k_w, k_b = jax.random.split(key, 3)

    # Synthetic dense TF-IDF rows (non-negative, L2-normalized like sklearn).
    raw = jax.random.uniform(k_tfidf, (B, V), dtype=jnp.float32)
    raw = jnp.where(raw > 0.8, raw, 0.0)  # sparse-ish
    tfidfs = raw / (jnp.linalg.norm(raw, axis=1, keepdims=True) + 1e-8)

    # nn.Linear(V, C) init: U(-1/sqrt(V), 1/sqrt(V)); stored as [V, C] (W^T).
    bound = 1.0 / (V ** 0.5)
    weight_t = jax.random.uniform(
        k_w, (V, C), dtype=jnp.float32, minval=-bound, maxval=bound
    )
    bias = jax.random.uniform(
        k_b, (C,), dtype=jnp.float32, minval=-bound, maxval=bound
    )

    # Params padded/cast once (hoisted out of the per-call path).
    # tk_max=128 -> two reduction steps, exercising the in-output accumulator.
    params = prepare_tfidf_params(weight_t, bias, tk_max=128)

    preds, scores = tfidf_forward(tfidfs, params, threshold)
    jax.block_until_ready((preds, scores))

    # Reference check in plain JAX (f32).
    scores_ref = tfidfs @ weight_t + bias
    preds_ref = jax.nn.sigmoid(scores_ref) > threshold
    logit_t = float(math.log(threshold / (1.0 - threshold)))  # = 0.0

    # bf16 inputs with f32 accumulation -> loose tolerance on scores
    # (documented / accepted; keep activations f32 if exact parity matters).
    assert jnp.allclose(scores, scores_ref, atol=3e-2, rtol=3e-2)
    # preds must be exactly consistent with the kernel's own scores ...
    assert bool(jnp.all(preds == (scores > logit_t)))
    # ... and agree with the f32 reference away from the decision boundary.
    near_boundary = jnp.abs(scores_ref - logit_t) < 1e-2
    assert bool(jnp.all((preds == preds_ref) | near_boundary))

    print("KERNEL_OK")
</pallas_src>

<mosaic_0001>
module attributes {stable_mosaic.version = 11 : i64} {
  func.func @kernel(%arg0: i32, %arg1: i32, %arg2: i32, %arg3: memref<32x128xbf16, #tpu.memory_space<vmem>>, %arg4: memref<128x128xbf16, #tpu.memory_space<vmem>>, %arg5: memref<1x128xf32, #tpu.memory_space<vmem>>, %arg6: memref<32x128xf32, #tpu.memory_space<vmem>>, %arg7: memref<32x128xi8, #tpu.memory_space<vmem>>) attributes {dimension_semantics = [#tpu.dimension_semantics<parallel>, #tpu.dimension_semantics<parallel>, #tpu.dimension_semantics<arbitrary>], iteration_bounds = array<i64: 1, 1, 2>, scalar_prefetch = 0 : i64, scratch_operands = 0 : i64, tpu.core_type = #tpu.core_type<tc>, window_params = [{transform_indices = @transform_0, window_bounds = array<i64: 32, 128>}, {transform_indices = @transform_1, window_bounds = array<i64: 128, 128>}, {transform_indices = @transform_2, window_bounds = array<i64: 1, 128>}, {transform_indices = @transform_3, window_bounds = array<i64: 32, 128>}, {transform_indices = @transform_4, window_bounds = array<i64: 32, 128>}]} {
    %c0_i32 = arith.constant 0 : i32
    %0 = arith.cmpi eq, %arg2, %c0_i32 : i32
    %1 = arith.extui %0 : i1 to i32
    %c0_i32_0 = arith.constant 0 : i32
    %2 = arith.cmpi ne, %1, %c0_i32_0 : i32
    scf.if %2 {
      %cst_9 = arith.constant 0.000000e+00 : f32
      %12 = vector.broadcast %cst_9 : f32 to vector<32x128xf32>
      %c0_10 = arith.constant 0 : index
      %c0_11 = arith.constant 0 : index
      %13 = vector.load %arg6[%c0_10, %c0_11] : memref<32x128xf32, #tpu.memory_space<vmem>>, vector<32x128xf32>
      tpu.vector_store %arg6[%c0_10, %c0_11], %12 {strides = array<i32>} : memref<32x128xf32, #tpu.memory_space<vmem>>, vector<32x128xf32>,
    } else {
    }
    %c0 = arith.constant 0 : index
    %c0_1 = arith.constant 0 : index
    %3 = vector.load %arg6[%c0, %c0_1] : memref<32x128xf32, #tpu.memory_space<vmem>>, vector<32x128xf32>
    %c0_2 = arith.constant 0 : index
    %c0_3 = arith.constant 0 : index
    %4 = vector.load %arg3[%c0_2, %c0_3] : memref<32x128xbf16, #tpu.memory_space<vmem>>, vector<32x128xbf16>
    %c0_4 = arith.constant 0 : index
    %c0_5 = arith.constant 0 : index
    %5 = vector.load %arg4[%c0_4, %c0_5] : memref<128x128xbf16, #tpu.memory_space<vmem>>, vector<128x128xbf16>
    %cst = arith.constant dense<0.000000e+00> : vector<32x128xf32>
    %6 = tpu.matmul %4, %5, %cst {dimension_numbers = #tpu.dot_dimension_numbers<[1], [0], [0], [1], [0, 0, 1, 1], [], []>} : vector<32x128xbf16>, vector<128x128xbf16>, vector<32x128xf32> -> vector<32x128xf32>
    %7 = arith.addf %3, %6 : vector<32x128xf32>
    %c0_6 = arith.constant 0 : index
    %c0_7 = arith.constant 0 : index
    %8 = vector.load %arg6[%c0_6, %c0_7] : memref<32x128xf32, #tpu.memory_space<vmem>>, vector<32x128xf32>
    tpu.vector_store %arg6[%c0_6, %c0_7], %7 {strides = array<i32>} : memref<32x128xf32, #tpu.memory_space<vmem>>, vector<32x128xf32>,
    %c1_i32 = arith.constant 1 : i32
    %9 = arith.cmpi eq, %arg2, %c1_i32 : i32
    %10 = arith.extui %9 : i1 to i32
    %c0_i32_8 = arith.constant 0 : i32
    %11 = arith.cmpi ne, %10, %c0_i32_8 : i32
    scf.if %11 {
      %c0_9 = arith.constant 0 : index
      %c0_10 = arith.constant 0 : index
      %12 = vector.load %arg6[%c0_9, %c0_10] : memref<32x128xf32, #tpu.memory_space<vmem>>, vector<32x128xf32>
      %c0_11 = arith.constant 0 : index
      %c0_12 = arith.constant 0 : index
      %13 = vector.load %arg5[%c0_11, %c0_12] : memref<1x128xf32, #tpu.memory_space<vmem>>, vector<1x128xf32>
      %14 = vector.broadcast %13 : vector<1x128xf32> to vector<32x128xf32>
      %15 = arith.addf %12, %14 : vector<32x128xf32>
      %c0_13 = arith.constant 0 : index
      %c0_14 = arith.constant 0 : index
      %16 = vector.load %arg6[%c0_13, %c0_14] : memref<32x128xf32, #tpu.memory_space<vmem>>, vector<32x128xf32>
      tpu.vector_store %arg6[%c0_13, %c0_14], %15 {strides = array<i32>} : memref<32x128xf32, #tpu.memory_space<vmem>>, vector<32x128xf32>,
      %cst_15 = arith.constant 0.000000e+00 : f32
      %17 = vector.broadcast %cst_15 : f32 to vector<32x128xf32>
      %18 = arith.cmpf ogt, %15, %17 : vector<32x128xf32>
      %19 = arith.extui %18 : vector<32x128xi1> to vector<32x128xi8>
      %c0_16 = arith.constant 0 : index
      %c0_17 = arith.constant 0 : index
      %20 = vector.load %arg7[%c0_16, %c0_17] : memref<32x128xi8, #tpu.memory_space<vmem>>, vector<32x128xi8>
      tpu.vector_store %arg7[%c0_16, %c0_17], %19 {strides = array<i32>} : memref<32x128xi8, #tpu.memory_space<vmem>>, vector<32x128xi8>,
    } else {
    }
    return
  }
  func.func @transform_0(%arg0: i32, %arg1: i32, %arg2: i32) -> (i32, i32) {
    %c0_i32 = arith.constant 0 : i32
    return %arg0, %arg2 : i32, i32
  }
  func.func @transform_1(%arg0: i32, %arg1: i32, %arg2: i32) -> (i32, i32) {
    %c0_i32 = arith.constant 0 : i32
    return %arg2, %arg1 : i32, i32
  }
  func.func @transform_2(%arg0: i32, %arg1: i32, %arg2: i32) -> (i32, i32) {
    %c0_i32 = arith.constant 0 : i32
    %c0_i32_0 = arith.constant 0 : i32
    return %c0_i32, %arg1 : i32, i32
  }
  func.func @transform_3(%arg0: i32, %arg1: i32, %arg2: i32) -> (i32, i32) {
    %c0_i32 = arith.constant 0 : i32
    return %arg0, %arg1 : i32, i32
  }
  func.func @transform_4(%arg0: i32, %arg1: i32, %arg2: i32) -> (i32, i32) {
    %c0_i32 = arith.constant 0 : i32
    return %arg0, %arg1 : i32, i32
  }
}

</mosaic_0001>

<bundles_post_ra>
// kernel: tpu_custom_call.1
= control target key start
LH: loop header
LB: loop body
LE: loop exit
PB: predicated region body
PF: predicated region fallthrough
CT: control target
= control target key end

     0   :  { %10 = vsyncpa [#allocation3], 0  ;;  %s1240_s0 = inlined_call_operand.hbm [shape: bf16[32,256], index: 0, kind: input, shape index: {}]   ;;  %s1241_s1 = inlined_call_operand.hbm [shape: bf16[256,128], index: 1, kind: input, shape index: {}]   ;;  %s1242_s2 = inlined_call_operand.vmem [shape: f32[1,128], index: 2, kind: input, shape index: {}]   ;;  %s1243_s3 = inlined_call_operand.hbm [shape: f32[32,128], index: 3, kind: output, shape index: {0}]   ;;  %s1244_s4 = inlined_call_operand.hbm [shape: s8[32,128], index: 4, kind: output, shape index: {1}]  }
   0x1   :  { %12 = vsyncpa [#allocation3 + $0x1], 0 }
   0x2   :  { %13 = vsyncpa [#allocation6], 0 }
   0x3   :  { %15 = vsyncpa [#allocation6 + $0x1], 0 }
   0x4   :  { %16 = vsyncpa [#allocation4], 0 }
   0x5   :  { %17 = vsyncpa [#allocation9], 0  ;;  %s995_s15 = smov 0   ;;  %s997_s16 = smov 0  }
   0x6   :  { %s999_s17 = smov 0   ;;  %s1001_s18 = smov 0  }
   0x7   :  { %s1003_s19 = smov 0   ;;  %s1005_s20 = smov 0  }
   0x8 LB: > { %s630_s21 = sadd.s32 4294967295, %s957_s20   ;;  %s35_s22 = sadd.s32 1, %s953_s19  ;;  %s957_s20 = sphi %s1005_s20, %s23_s20   ;;  %s953_s19 = sphi %s1003_s19, %s1257_s19   ;;  %s949_s18 = sphi %s1001_s18, %s1256_s18   ;;  %s945_s17 = sphi %s999_s17, %s1255_s17   ;;  %s941_s16 = sphi %s997_s16, %s1254_s16   ;;  %s937_s15 = sphi %s995_s15, %s1253_s15  }
   0x9   : > { %p36_p0 = scmp.ge.s32.totalorder %s35_s22, 2  ;;  %s51_s23 = sadd.s32 1, %s945_s17 }
   0xa   : > { %p58_p1 = scmp.ne.s32.totalorder %s945_s17, %s941_s16  ;;  %p59_p2 = scmp.eq.s32.totalorder %s957_s20, 0 }
   0xb   : > { %s1259_s22 = smov (%p36_p0, %s35_s22), 0  ;;  %p64_p4 = scmp.ne.s32.totalorder %s941_s16, %s937_s15 }
   0xc   : > { %p1031_p3 = por %p59_p2, %p58_p1  ;;  %s47_s25 = ssub.s32 %s953_s19, %s1259_s22 }
   0xd   : > { %p65_p5 = scmp.eq.s32.totalorder %s630_s21, 0  ;;  %p49_p6 = scmp.eq.s32.totalorder %s47_s25, 0 }
   0xe   : > { %p711_p8 = scmp.lt.s32.totalorder %s957_s20, 2  ;;  %s1049_s28 = sand.u32 1, %s945_s17  }
   0xf   : > { %p1040_p7 = por %p65_p5, %p64_p4  ;;  %s635_s29 = sshll.u32 %s953_s19, 6 }
  0x10   : > { %s1046_s27 = scalar_select %p49_p6, %s945_s17, %s51_s23  }
  0x11   : > { %s1247_s26 = scalar_select %p1040_p7, 1, 0 }
  0x12   : > { %s634_s30 = sshll.u32 %s1049_s28, 4  ;;  %s1056_s7 = scalar_lea.hbm %s1240_s0, %s635_s29 }
  0x13   : > { %s208_s8 = scalar_lea.vmem [#allocation2], %s634_s30  ;;  %p1060_p9 = pnand %p711_p8, %p1031_p3 }
  0x14   : > { %s217_s9 = sshll.u32 %s208_s8, 4  ;;  %s205_s11 = scalar_lea.sflag [#allocation3], %s1049_s28  ;;  %s1064_s9 = int_to_ptr.vmem [resolvable:$true] %s217_s9 }
  0x15   : > { %s783_s12 = scalar_lea.hbm %s1056_s7, 256  ;;  %p785_p12 = pneg %p1060_p9 }
  0x16   : > { %p784_p11 = scmp.ne.s32.totalorder %s1056_s7, %s783_s12  ;;  %s788_s15 = scalar_lea.hbm %s1240_s0, 512 }
  0x17   : > { %p789_p1 = scmp.lt.u32.totalorder %s1056_s7, %s1240_s0  ;;  %p790_p2 = scmp.lt.u32.totalorder %s788_s15, %s783_s12 }
  0x18   : > { %p786_p13 = pnand %p785_p12, %p784_p11  ;;  %p792_p4 = scmp.lt.u32.totalorder %s783_s12, %s1056_s7 }
  0x19   : > { %p791_p3 = por %p790_p2, %p789_p1 }
  0x1a   : > { %p787_p0 = pneg %p786_p13 }
  0x1b   : > { %p793_p5 = por %p792_p4, %p791_p3 }
  0x1d   : > { %p794_p6 = pnand %p793_p5, %p787_p0 }
  0x1f   : > { %797 = shalt.err (!%p794_p6)
}
  0x20   : > { %s798_s25 = scalar_lea.vmem %s1064_s9, 256  ;;  %s959_s29 = smov [#allocation2]  }
  0x21   : > { %p799_p8 = scmp.ne.s32.totalorder %s1064_s9, %s798_s25  ;;  %s803_s30 = sshll.u32 %s959_s29, 4  ;;  %s804_s30 = int_to_ptr.vmem [resolvable:$false] %s803_s30 }
  0x22   : > { %s805_s5 = scalar_lea.vmem %s804_s30, 512  ;;  %p806_p10 = scmp.lt.s32.totalorder %s1064_s9, %s804_s30 }
  0x23   : > { %p801_p11 = pnand %p799_p8, %p785_p12  ;;  %p807_p1 = scmp.lt.s32.totalorder %s805_s5, %s798_s25 }
  0x25   : > { %p802_p13 = pneg %p801_p11  ;;  %p808_p2 = por %p807_p1, %p806_p10 }
  0x27   : > { %p809_p3 = pnand %p808_p2, %p802_p13 }
  0x29   : > { %812 = shalt.err (!%p809_p3)
}
  0x2a   : > { %s960_s6 = smov 128   ;;  %s961_s8 = smov 64  }
  0x2b   : > { %s962_s12 = smov 4   ;;  %p247_p10 = scmp.lt.s32.totalorder %s957_s20, 3 }
  0x2c   : > { %707 = dma.hbm_to_vmem [thread:$0]  (!%p1060_p9), %s1056_s7, 256, %s1064_s9, %s205_s11, %s960_s6, %s961_s8, %s962_s12  }
  0x2d   : > { %s636_s13 = sshll.u32 %s1049_s28, 6  ;;  %s661_s14 = sshll.u32 %s953_s19, 10 }
  0x2e   : > { %p1249_p0 = scmp.ge.s32.totalorder %s957_s20, 1  ;;  %s1109_s25 = scalar_lea.hbm %s1241_s1, %s661_s14 }
  0x2f   : > { %s231_s29 = scalar_lea.vmem [#allocation5], %s636_s13  ;;  %s228_s7 = scalar_lea.sflag [#allocation6], %s1049_s28 }
  0x30   : > { %p1102_p4 = pnand %p1249_p0, %p247_p10  ;;  %s239_s30 = sshll.u32 %s231_s29, 4  ;;  %s1111_s30 = int_to_ptr.vmem [resolvable:$true] %s239_s30 }
  0x31   : > { %s813_s9 = scalar_lea.hbm %s1109_s25, 1024  ;;  %s818_s6 = scalar_lea.hbm %s1241_s1, 2048 }
  0x32   : > { %p814_p5 = scmp.ne.s32.totalorder %s1109_s25, %s813_s9  ;;  %p819_p11 = scmp.lt.u32.totalorder %s1109_s25, %s1241_s1 }
  0x33   : > { %p820_p13 = scmp.lt.u32.totalorder %s818_s6, %s813_s9  ;;  %p822_p2 = scmp.lt.u32.totalorder %s813_s9, %s1109_s25 }
  0x34   : > { %p816_p6 = pnand %p814_p5, %p785_p12 }
  0x35   : > { %p821_p1 = por %p820_p13, %p819_p11 }
  0x36   : > { %p817_p8 = pneg %p816_p6 }
  0x37   : > { %p823_p3 = por %p822_p2, %p821_p1 }
  0x39   : > { %p824_p10 = pnand %p823_p3, %p817_p8 }
  0x3b   : > { %827 = shalt.err (!%p824_p10)
}
  0x3c   : > { %s828_s13 = scalar_lea.vmem %s1111_s30, 1024  ;;  %s963_s24 = smov [#allocation5]  }
  0x3d   : > { %p829_p0 = scmp.ne.s32.totalorder %s1111_s30, %s828_s13  ;;  %s833_s29 = sshll.u32 %s963_s24, 4  ;;  %s834_s29 = int_to_ptr.vmem [resolvable:$false] %s833_s29 }
  0x3e   : > { %s835_s11 = scalar_lea.vmem %s834_s29, 2048  ;;  %p836_p7 = scmp.lt.s32.totalorder %s1111_s30, %s834_s29 }
  0x3f   : > { %p831_p5 = pnand %p829_p0, %p785_p12  ;;  %p837_p11 = scmp.lt.s32.totalorder %s835_s11, %s828_s13 }
  0x41   : > { %p832_p6 = pneg %p831_p5  ;;  %p838_p13 = por %p837_p11, %p836_p7 }
  0x43   : > { %p839_p1 = pnand %p838_p13, %p832_p6 }
  0x45   : > { %842 = shalt.err (!%p839_p1)
}
  0x46   : > { %710 = dma.hbm_to_vmem [thread:$0]  (!%p1060_p9), %s1109_s25, 1024, %s1111_s30, %s228_s7, %s961_s8, %s961_s8, %s962_s12  }
  0x47   : > { %251 = sbr.rel (%p1102_p4) target bundleno = 407 (0x197), region = 32  ;;  %s253_s9 = sand.u32 (!%p1102_p4), 1, %s941_s16  }
  0x48   : > { %s640_s5 = sshll.u32 (!%p1102_p4), %s253_s9, 4  ;;  %s254_s6 = scalar_lea.sflag (!%p1102_p4), [#allocation3], %s253_s9 }
  0x49   : > { %s1145_s14 = scalar_lea.vmem (!%p1102_p4), [#allocation2], %s640_s5  ;;  %p1251_p7 = scmp.ne.s32.totalorder (!%p1102_p4), %s1247_s26, 0 }
  0x4e   : > { %920 = dma.done.wait (%p1251_p7), %s254_s6, 256  }
  0x4f   : > { %922 = vsyncadd (%p1251_p7), %s254_s6, 4294967040  ;;  %s641_s28 = sshll.u32 %s253_s9, 6  ;;  %s263_s10 = scalar_lea.sflag [#allocation6], %s253_s9 }
  0x50   : > { %s1151_s23 = scalar_lea.vmem [#allocation5], %s641_s28 }
  0x51   : > { %924 = dma.done.wait (%p1251_p7), %s263_s10, 1024  }
  0x52   : > { %926 = vsyncadd (%p1251_p7), %s263_s10, 4294966272  ;;  %p642_p9 = scmp.ne.s32.totalorder %s949_s18, 0 }
  0x53   : > { %v964_v0 = vmov (!%p642_p9), 0.0  }
  0x54   : > { %306 = sbr.rel (%p642_p9) target bundleno = 91 (0x5b), region = 44  ;;  %307 = vst [vmem:[#allocation7] sm:$0xff] (!%p642_p9), %v964_v0  ;;  %308 = vst [vmem:[#allocation7 + $0x8] sm:$0xff] (!%p642_p9), %v964_v0 }
  0x55   : > { %309 = vst [vmem:[#allocation7 + $0x10] sm:$0xff] (!%p642_p9), %v964_v0  ;;  %310 = vst [vmem:[#allocation7 + $0x18] sm:$0xff] (!%p642_p9), %v964_v0 }
  0x5b PF: > { %v773_v1 = vld [vmem:[%s1151_s23] sm:$0xff]   ;;  %v774_v2 = vld [vmem:[%s1151_s23 + $0x8] sm:$0xff]   ;;  %v775_v3 = vld [vmem:[%s1151_s23 + $0x10] sm:$0xff]   ;;  %p653_p12 = scmp.ne.s32.totalorder %s949_s18, 1 }
  0x5c   : > { %672 = vmatprep.subr.bf16.mxu0 %v773_v1  ;;  %v776_v4 = vld [vmem:[%s1151_s23 + $0x18] sm:$0xff]   ;;  %v781_v5 = vld [vmem:[%s1145_s14] sm:$0xff]   ;;  %v778_v7 = vld [vmem:[%s1151_s23 + $0x28] sm:$0xff]   ;;  %v965_v32 = vmov (!%p653_p12), 0  }
  0x5d   : > { %673 = vmatpush3.bf16.msra.mxu0 %v773_v1  ;;  %688 = vmatprep.mubr.bf16.mxu0 %v781_v5  ;;  %v777_v6 = vld [vmem:[%s1151_s23 + $0x20] sm:$0xff]   ;;  %v779_v8 = vld [vmem:[%s1151_s23 + $0x30] sm:$0xff]   ;;  %v780_v9 = vld [vmem:[%s1151_s23 + $0x38] sm:$0xff]  }
  0x5e   : > { %674 = vmatprep.subr.bf16.mxu0 %v774_v2  ;;  %v782_v10 = vld [vmem:[%s1145_s14 + $0x8] sm:$0xff]   ;;  %v313_v11 = vld [vmem:[#allocation7 + $0x10] sm:$0xff]  ;;  %v311_v12 = vld [vmem:[#allocation7] sm:$0xff] }
  0x5f   : > { %v314_v14 = vld [vmem:[#allocation7 + $0x18] sm:$0xff]  ;;  %v312_v17 = vld [vmem:[#allocation7 + $0x8] sm:$0xff]  ;;  %v654_v24 = vld [vmem:[%s1242_s2] ss:$0 sm:$0xff] (!%p653_p12) }
  0x61   : > { %675 = vmatpush3.bf16.msra.mxu0 %v774_v2 }
  0x62   : > { %676 = vmatprep.subr.bf16.mxu0 %v775_v3 }
  0x65   : > { %677 = vmatpush3.bf16.msra.mxu0 %v775_v3 }
  0x66   : > { %678 = vmatprep.subr.bf16.mxu0 %v776_v4 }
  0x69   : > { %679 = vmatpush3.bf16.msra.mxu0 %v776_v4 }
  0x6a   : > { %680 = vmatprep.subr.bf16.mxu0 %v777_v6 }
  0x6d   : > { %681 = vmatpush3.bf16.msra.mxu0 %v777_v6 }
  0x6e   : > { %682 = vmatprep.subr.bf16.mxu0 %v778_v7 }
  0x71   : > { %683 = vmatpush3.bf16.msra.mxu0 %v778_v7 }
  0x72   : > { %684 = vmatprep.subr.bf16.mxu0 %v779_v8 }
  0x75   : > { %685 = vmatpush3.bf16.msra.mxu0 %v779_v8 }
  0x76   : > { %686 = vmatprep.subr.bf16.mxu0 %v780_v9 }
  0x79   : > { %687 = vmatpush3.bf16.msra.mxu0 %v780_v9 }
  0x7c   : > { %689 = vmatmul.mubr.bf16.vlgmr.msra.gmra.mrb[0].mxu0 %v782_v10 }
 0x14f   : > { %v690_v13 = vpop.f32.mrb[0].mxu0  ;;  %455 = sbr.rel (%p653_p12) target bundleno = 356 (0x164), region = 48 }
 0x150   : > { %v446_v15 = vadd.f32 %v690_v13, %v313_v11  ;;  %v429_v16 = vpop.f32.mrb[1].mxu0 }
 0x151   : > { %v444_v18 = vadd.f32 %v429_v16, %v311_v12  ;;  %v691_v19 = vpop.f32.mrb[2].mxu0 }
 0x152   : > { %450 = vst [vmem:[#allocation7 + $0x10] sm:$0xff] %v446_v15  ;;  %v447_v20 = vadd.f32 %v691_v19, %v314_v14  ;;  %v432_v21 = vpop.f32.mrb[3].mxu0 }
 0x153   : > { %448 = vst [vmem:[#allocation7] sm:$0xff] %v444_v18  ;;  %v445_v22 = vadd.f32 %v432_v21, %v312_v17 }
 0x154   : > { %451 = vst [vmem:[#allocation7 + $0x18] sm:$0xff] %v447_v20 }
 0x155   : > { %449 = vst [vmem:[#allocation7 + $0x8] sm:$0xff] %v445_v22 }
 0x159   : > { %v458_v28 = vld [vmem:[#allocation7 + $0x10] sm:$0xff] }
 0x15a   : > { %v456_v23 = vld [vmem:[#allocation7] sm:$0xff]  ;;  %v469_v30 = vadd.f32 %v654_v24, %v458_v28 }
 0x15b   : > { %v467_v26 = vadd.f32 %v654_v24, %v456_v23  ;;  %v459_v29 = vld [vmem:[#allocation7 + $0x18] sm:$0xff] }
 0x15c   : > { %v457_v25 = vld [vmem:[#allocation7 + $0x8] sm:$0xff]  ;;  %v470_v31 = vadd.f32 %v654_v24, %v459_v29  ;;  %473 = vst [vmem:[#allocation7 + $0x10] sm:$0xff] %v469_v30  ;;  %vm477_vm2 = vcmp.gt.f32.partialorder %v469_v30, 0.0 }
 0x15d   : > { %v468_v27 = vadd.f32 %v654_v24, %v457_v25  ;;  %471 = vst [vmem:[#allocation7] sm:$0xff] %v467_v26  ;;  %vm475_vm0 = vcmp.gt.f32.partialorder %v467_v26, 0.0 }
 0x15e   : > { %474 = vst [vmem:[#allocation7 + $0x18] sm:$0xff] %v470_v31  ;;  %vm478_vm3 = vcmp.gt.f32.partialorder %v470_v31, 0.0 }
 0x15f   : > { %472 = vst [vmem:[#allocation7 + $0x8] sm:$0xff] %v468_v27  ;;  %vm476_vm1 = vcmp.gt.f32.partialorder %v468_v27, 0.0  ;;  %vm480_vm5 = vmpackc.low %vm478_vm3, %vm477_vm2 }
 0x160   : > { %vm479_vm4 = vmpackc.low %vm476_vm1, %vm475_vm0 }
 0x161   : > { %vm481_vm6 = vmpackc.even %vm480_vm5, %vm479_vm4 }
 0x162   : > { %v482_v33 = vsel %vm481_vm6, 16843009, %v965_v32 }
 0x163   : > { %483 = vst [vmem:[#allocation8] sm:$0xff] %v482_v33 }
 0x164 PF: > { %p1174_p4 = scmp.eq.s32.totalorder %s630_s21, 1  ;;  %s966_s12 = smov [#allocation7]  }
 0x165   : > { %s494_s15 = sshll.u32 %s966_s12, 4  ;;  %s495_s15 = int_to_ptr.vmem [resolvable:$true] %s494_s15 }
 0x166   : > { %s843_s25 = scalar_lea.vmem %s495_s15, 512  ;;  %p850_p10 = scmp.lt.s32.totalorder %s495_s15, %s495_s15 }
 0x167   : > { %p844_p8 = scmp.ne.s32.totalorder %s495_s15, %s843_s25  ;;  %p851_p0 = scmp.lt.s32.totalorder %s843_s25, %s843_s25 }
 0x169   : > { %p845_p2 = pnand %p844_p8, %p1174_p4  ;;  %p852_p5 = por %p851_p0, %p850_p10 }
 0x16b   : > { %p846_p3 = pneg %p845_p2 }
 0x16d   : > { %p853_p6 = pnand %p852_p5, %p846_p3 }
 0x16f   : > { %856 = shalt.err (!%p853_p6)
}
 0x170   : > { %s857_s21 = scalar_lea.hbm %s1243_s3, 512 }
 0x171   : > { %p858_p11 = scmp.ne.s32.totalorder %s1243_s3, %s857_s21  ;;  %p863_p7 = scmp.lt.u32.totalorder %s857_s21, %s1243_s3 }
 0x173   : > { %p859_p13 = pnand %p858_p11, %p1174_p4 }
 0x175   : > { %p860_p1 = pneg %p859_p13 }
 0x177   : > { %p865_p9 = pnand %p863_p7, %p860_p1 }
 0x179   : > { %868 = shalt.err (!%p865_p9)
}
 0x17a   : > { %s967_s9 = smov 128   ;;  %s968_s5 = smov 8  }
 0x17b   : > { %697 = dma.vmem_to_hbm [thread:$0]  (%p1174_p4), %s495_s15, 512, %s1243_s3, [#allocation4], %s967_s9, %s967_s9, %s968_s5  }
 0x17c   : > { %s969_s28 = smov [#allocation8]  }
 0x17d   : > { %s511_s10 = sshll.u32 %s969_s28, 4  ;;  %s512_s10 = int_to_ptr.vmem [resolvable:$true] %s511_s10 }
 0x17e   : > { %s869_s23 = scalar_lea.vmem %s512_s10, 128  ;;  %p876_p3 = scmp.lt.s32.totalorder %s512_s10, %s512_s10 }
 0x17f   : > { %p870_p12 = scmp.ne.s32.totalorder %s512_s10, %s869_s23  ;;  %p877_p10 = scmp.lt.s32.totalorder %s869_s23, %s869_s23 }
 0x181   : > { %p871_p8 = pnand %p870_p12, %p1174_p4  ;;  %p878_p0 = por %p877_p10, %p876_p3 }
 0x183   : > { %p872_p2 = pneg %p871_p8 }
 0x185   : > { %p879_p5 = pnand %p878_p0, %p872_p2 }
 0x187   : > { %882 = shalt.err (!%p879_p5)
}
 0x188   : > { %s883_s12 = scalar_lea.hbm %s1244_s4, 128 }
 0x189   : > { %p884_p6 = scmp.ne.s32.totalorder %s1244_s4, %s883_s12  ;;  %p889_p1 = scmp.lt.u32.totalorder %s883_s12, %s1244_s4 }
 0x18b   : > { %p885_p11 = pnand %p884_p6, %p1174_p4 }
 0x18d   : > { %p886_p13 = pneg %p885_p11 }
 0x18f   : > { %p891_p7 = pnand %p889_p1, %p886_p13 }
 0x191   : > { %894 = shalt.err (!%p891_p7)
}
 0x192   : > { %699 = dma.vmem_to_hbm [thread:$0]  (%p1174_p4), %s512_s10, 128, %s1244_s4, [#allocation9]  }
 0x193   : > { %928 = dma.done.wait (%p1174_p4), [#allocation4], 512  }
 0x194   : > { %930 = vsyncadd (%p1174_p4), [#allocation4], 4294966784 }
 0x195   : > { %932 = dma.done.wait (%p1174_p4), [#allocation9], 128  }
 0x196   : > { %934 = vsyncadd (%p1174_p4), [#allocation9], 4294967168 }
 0x197 PF: > { %s23_s20 = sadd.s32 1, %s957_s20   ;;  %s1253_s15 = smov %s941_s16 }
 0x198   : > { %p20_p9 = scmp.ge.s32.totalorder %s23_s20, 4   ;;  %s1254_s16 = smov %s945_s17 }
 0x199   : > { %s1255_s17 = smov %s1046_s27  ;;  %s1256_s18 = smov %s953_s19 }
 0x19a   : > { %s1257_s19 = smov %s1259_s22  ;;  %22 = sbr.rel (!%p20_p9) target bundleno = 8 (0x8), region = 103 }
 0x1a1   :  { %528 = vsyncpa [#allocation3], 1 }
 0x1a2   :  { %530 = vsyncpa [#allocation3 + $0x1], 1 }
 0x1a3   :  { %531 = vsyncpa [#allocation6], 1 }
 0x1a4   :  { %533 = vsyncpa [#allocation6 + $0x1], 1 }
 0x1a5   :  { %534 = vsyncpa [#allocation4], 1 }
 0x1a6   :  { %536 = vsyncpa [#allocation4 + $0x1], 1 }
 0x1a7   :  { %537 = vsyncpa [#allocation9], 1 }

</bundles_post_ra>
